<compile_context>
chip_gen: v7x
topology: tpu7x:2x2x1
jax: 0.10.0
libtpu: 0.0.40
codegen_flags: <defaults>
</compile_context>

<pallas_src>
import jax
import jax.numpy as jnp
from jax import lax
from jax.experimental import pallas as pl
from jax.experimental.pallas import tpu as pltpu


_VMEM_DATA_BUDGET = 40 * 1024 * 1024   # budget for resident + streamed blocks
_VMEM_LIMIT_BYTES = 48 * 1024 * 1024   # scoped limit passed to Mosaic
_TARGET_STREAM_BYTES = 2 * 1024 * 1024  # >= ~2 MiB image DMA per grid step


def _round_up(x: int, m: int) -> int:
    return ((x + m - 1) // m) * m


def _cdiv(a: int, b: int) -> int:
    return -(-a // b)


# --------------------------------------------------------------------------
# Kernels
# --------------------------------------------------------------------------
def _poisson_loss_kernel_single(filt_ref, bias_ref, img_ref, spk_ref, out_ref):
    # filt_ref: (C, P)   matmul dtype   VMEM-resident (block index constant)
    # bias_ref: (C, 1)   f32            VMEM-resident
    # img_ref:  (TB, P)  matmul dtype   streamed over batch tiles
    # spk_ref:  (C, TB)  f32            streamed over batch tiles (transposed)
    # out_ref:  (1, TB)  f32            lane-dense per-tile loss row
    gen = lax.dot_general(
        filt_ref[...], img_ref[...],
        dimension_numbers=(((1,), (1,)), ((), ())),       # contract P with P
        preferred_element_type=jnp.float32)               # (C, TB) f32 on MXU
    gen = gen + bias_ref[...]                             # lane-broadcast bias
    loss = jnp.exp(gen) - gen * spk_ref[...]              # EUP + VPU, (C, TB)
    out_ref[...] = jnp.sum(loss, axis=0, keepdims=True)   # sublane reduce


def _poisson_loss_kernel_ktiled(filt_ref, bias_ref, img_ref, spk_ref, out_ref,
                                acc_ref):
    # Same as above but the pixel axis P is tiled (grid axis 1, 'arbitrary');
    # acc_ref: (C, TB) f32 accumulator scratch persisting across k steps.
    k = pl.program_id(1)

    @pl.when(k == 0)
    def _():
        acc_ref[...] = jnp.zeros_like(acc_ref)

    acc_ref[...] += lax.dot_general(
        filt_ref[...], img_ref[...],
        dimension_numbers=(((1,), (1,)), ((), ())),
        preferred_element_type=jnp.float32)

    @pl.when(k == pl.num_programs(1) - 1)
    def _():
        gen = acc_ref[...] + bias_ref[...]
        loss = jnp.exp(gen) - gen * spk_ref[...]
        out_ref[...] = jnp.sum(loss, axis=0, keepdims=True)


# --------------------------------------------------------------------------
# Tile selection
# --------------------------------------------------------------------------
def _choose_tiles(B, C, P, itemsize, *, block_b=None, block_p=None,
                  vmem_budget=_VMEM_DATA_BUDGET,
                  target_stream_bytes=_TARGET_STREAM_BYTES):
    C_pad = _round_up(C, 8)

    def fixed_bytes(tp):
        tp_pad = _round_up(tp, 128)
        # Resident filter tile (conservatively assume double-buffered
        # allocation even though it is only DMA'd once) + (C,1) bias block.
        return 2 * C_pad * tp_pad * itemsize + 2 * C_pad * 128 * 4

    def per_row_bytes(tp):
        tp_pad = _round_up(tp, 128)
        return (2 * tp_pad * itemsize      # image double buffer
                + 2 * C_pad * 4            # spikes^T double buffer
                + 2 * 8 * 4                # (1, TB) output block
                + C_pad * 4)               # f32 accumulator scratch

    # ---- pixel (reduction) tile ----
    if block_p is not None:
        TP = int(block_p)
    else:
        candidates = [P] + [tp for tp in range((P // 128) * 128, 0, -128)
                            if P % tp == 0]
        TP = None
        for tp in candidates:
            if fixed_bytes(tp) + 128 * per_row_bytes(tp) <= vmem_budget:
                TP = tp
                break
        if TP is None:
            # TODO(synk): filter bank too large even for a 128-wide pixel
            # tile; fall back to a single K tile and rely on the raised
            # vmem limit.
            TP = P

    # ---- batch tile ----
    tb_vmem = (vmem_budget - fixed_bytes(TP)) // per_row_bytes(TP)
    tb_vmem = max(128, (tb_vmem // 128) * 128)

    if block_b is not None:
        TB = max(128, min(_round_up(int(block_b), 128), tb_vmem,
                          _round_up(B, 128)))
        return TB, TP

    # Big enough that each image DMA is >= target_stream_bytes (amortizes the
    # ~0.35 us per-grid-step overhead on fast-HBM parts).
    tb_target = _round_up(max(1, _cdiv(target_stream_bytes, TP * itemsize)), 128)
    TB = max(128, min(tb_vmem, tb_target, _round_up(B, 128)))

    # v7x megacore: prefer >= 2 batch tiles so the 'parallel' axis can split
    # across the two TensorCores (no-op on single-TC v5e/v6e).
    if B > 128 and _cdiv(B, TB) == 1:
        TB = max(128, _round_up(_cdiv(B, 2), 128))
    return TB, TP


# --------------------------------------------------------------------------
# Wrapper
# --------------------------------------------------------------------------
def batch_poisson_encoding_loss(batched_images, batched_spikes,
                                lnp_filters, lnp_biases,
                                *, block_b=None, block_p=None):
    """JAX/Pallas equivalent of BatchPoissonEncodingLoss.forward.

    batched_images: (B, H, W)   -- streamed at its stored dtype (f32 or bf16)
    batched_spikes: (B, C)
    lnp_filters:    (C, H, W)
    lnp_biases:     (C,)
    returns:        (B,) float32 loss per problem
    """
    B = batched_images.shape[0]
    C, H, W = lnp_filters.shape
    P = H * W

    imgs_flat = batched_images.reshape(B, P)            # view; keep stored dtype
    filt = lnp_filters.reshape(C, P)                    # view; no HBM transpose
    if filt.dtype != imgs_flat.dtype:
        filt = filt.astype(imgs_flat.dtype)             # small (C,P) cast only
    bias = lnp_biases.reshape(C, 1).astype(jnp.float32)
    spikes_t = batched_spikes.astype(jnp.float32).T     # (C, B), tiny

    itemsize = jnp.dtype(imgs_flat.dtype).itemsize
    TB, TP = _choose_tiles(B, C, P, itemsize, block_b=block_b, block_p=block_p)
    n_btiles = _cdiv(B, TB)
    n_ktiles = _cdiv(P, TP)
    B_pad = n_btiles * TB

    if B < TB:
        # Single, partial batch tile: padding the images costs at most one
        # tile of HBM traffic, so keep every block fully in bounds.
        imgs_flat = jnp.pad(imgs_flat, ((0, B_pad - B), (0, 0)))
    # Otherwise the images are NOT padded: the boundary-clipped last block
    # reads unspecified rows whose results land only in output lanes >= B,
    # sliced off below.  (Do not reduce across batch lanes in-kernel.)
    if B_pad != B:
        spikes_t = jnp.pad(spikes_t, ((0, 0), (0, B_pad - B)))

    cost = pl.CostEstimate(
        flops=2 * B * P * C + 3 * B * C,
        transcendentals=B * C,
        bytes_accessed=itemsize * (B * P + C * P) + 4 * (B * C + C + B),
    )
    out_shape = jax.ShapeDtypeStruct((1, B_pad), jnp.float32)

    if n_ktiles == 1:
        out = pl.pallas_call(
            _poisson_loss_kernel_single,
            out_shape=out_shape,
            grid=(n_btiles,),
            in_specs=[
                pl.BlockSpec((C, P), lambda i: (0, 0)),    # filters: resident
                pl.BlockSpec((C, 1), lambda i: (0, 0)),    # biases:  resident
                pl.BlockSpec((TB, P), lambda i: (i, 0)),   # images:  streamed
                pl.BlockSpec((C, TB), lambda i: (0, i)),   # spikes^T: streamed
            ],
            out_specs=pl.BlockSpec((1, TB), lambda i: (0, i)),
            compiler_params=pltpu.CompilerParams(
                dimension_semantics=("parallel",),
                vmem_limit_bytes=_VMEM_LIMIT_BYTES),
            cost_estimate=cost,
        )(filt, bias, imgs_flat, spikes_t)
    else:
        out = pl.pallas_call(
            _poisson_loss_kernel_ktiled,
            out_shape=out_shape,
            grid=(n_btiles, n_ktiles),
            in_specs=[
                pl.BlockSpec((C, TP), lambda i, k: (0, k)),
                pl.BlockSpec((C, 1), lambda i, k: (0, 0)),
                pl.BlockSpec((TB, TP), lambda i, k: (i, k)),
                pl.BlockSpec((C, TB), lambda i, k: (0, i)),
            ],
            out_specs=pl.BlockSpec((1, TB), lambda i, k: (0, i)),
            scratch_shapes=[pltpu.VMEM((C, TB), jnp.float32)],
            compiler_params=pltpu.CompilerParams(
                dimension_semantics=("parallel", "arbitrary"),
                vmem_limit_bytes=_VMEM_LIMIT_BYTES),
            cost_estimate=cost,
        )(filt, bias, imgs_flat, spikes_t)

    return out[0, :B]


# --------------------------------------------------------------------------
# Reference + tests
# --------------------------------------------------------------------------
def _reference(batched_images, batched_spikes, lnp_filters, lnp_biases):
    B = batched_images.shape[0]
    C, H, W = lnp_filters.shape
    P = H * W
    imgs_flat = batched_images.reshape(B, P).astype(jnp.float32)
    filt = lnp_filters.reshape(C, P).astype(jnp.float32)
    gen = imgs_flat @ filt.T + lnp_biases[None, :].astype(jnp.float32)
    return jnp.sum(jnp.exp(gen) - gen * batched_spikes.astype(jnp.float32), axis=1)


if __name__ == "__main__":
    key = jax.random.PRNGKey(0)
    k_filt, k_bias, k_img, k_spk = jax.random.split(key, 4)

    # Small shapes consistent with the module: batch=2, n_cells=4, 16x16 image.
    B, C, H, W = 2, 4, 16, 16
    lnp_filters = 0.05 * jax.random.normal(k_filt, (C, H, W), dtype=jnp.float32)
    lnp_biases = 0.1 * jax.random.normal(k_bias, (C,), dtype=jnp.float32)
    batched_images = jax.random.normal(k_img, (B, H, W), dtype=jnp.float32)
    batched_spikes = jax.random.poisson(k_spk, 1.0, (B, C)).astype(jnp.float32)

    ref = _reference(batched_images, batched_spikes, lnp_filters, lnp_biases)

    # 1) f32 path, single tile.
    loss = jax.block_until_ready(
        batch_poisson_encoding_loss(batched_images, batched_spikes,
                                    lnp_filters, lnp_biases))
    assert loss.shape == (B,)
    assert jnp.allclose(loss, ref, rtol=1e-5, atol=1e-5), (loss, ref)

    # 2) Ragged multi-tile batch, auto tiling: images are NOT padded, the last
    #    batch block is boundary-clipped, and >=2 tiles feed the parallel axis.
    B2 = 300
    k_img2, k_spk2 = jax.random.split(jax.random.PRNGKey(1), 2)
    imgs2 = jax.random.normal(k_img2, (B2, H, W), dtype=jnp.float32)
    spk2 = jax.random.poisson(k_spk2, 1.0, (B2, C)).astype(jnp.float32)
    ref2 = _reference(imgs2, spk2, lnp_filters, lnp_biases)
    loss2 = jax.block_until_ready(
        batch_poisson_encoding_loss(imgs2, spk2, lnp_filters, lnp_biases))
    assert loss2.shape == (B2,)
    assert jnp.allclose(loss2, ref2, rtol=1e-5, atol=1e-5), (loss2, ref2)

    # 3) Explicit small tiles: 3 batch tiles x 2 pixel tiles -> exercises the
    #    K-tiled accumulator kernel (pl.when init/finalize + VMEM scratch).
    loss3 = jax.block_until_ready(
        batch_poisson_encoding_loss(imgs2, spk2, lnp_filters, lnp_biases,
                                    block_b=128, block_p=128))
    assert jnp.allclose(loss3, ref2, rtol=1e-5, atol=1e-5), (loss3, ref2)

    # 4) Inputs already stored in bf16 (honest bf16 streaming: no wrapper-side
    #    f32->bf16 cast of big tensors; f32 MXU accumulation + f32 exp).
    imgs_bf = batched_images.astype(jnp.bfloat16)
    filt_bf = lnp_filters.astype(jnp.bfloat16)
    ref_bf = _reference(imgs_bf.astype(jnp.float32), batched_spikes,
                        filt_bf.astype(jnp.float32), lnp_biases)
    loss_bf = jax.block_until_ready(
        batch_poisson_encoding_loss(imgs_bf, batched_spikes, filt_bf, lnp_biases))
    assert jnp.allclose(loss_bf, ref_bf, rtol=2e-2, atol=2e-2), (loss_bf, ref_bf)

    print("KERNEL_OK")
</pallas_src>

<mosaic_0001>
module attributes {stable_mosaic.version = 11 : i64} {
  func.func @_poisson_loss_kernel_single(%arg0: i32, %arg1: memref<4x256xf32, #tpu.memory_space<vmem>>, %arg2: memref<4x1xf32, #tpu.memory_space<vmem>>, %arg3: memref<128x256xf32, #tpu.memory_space<vmem>>, %arg4: memref<4x128xf32, #tpu.memory_space<vmem>>, %arg5: memref<1x128xf32, #tpu.memory_space<vmem>>) attributes {dimension_semantics = [#tpu.dimension_semantics<parallel>], iteration_bounds = array<i64: 1>, scalar_prefetch = 0 : i64, scratch_operands = 0 : i64, tpu.core_type = #tpu.core_type<tc>, window_params = [{pipeline_mode = #tpu.pipeline_mode<synchronous>, transform_indices = @transform_0, window_bounds = array<i64: 4, 256>}, {pipeline_mode = #tpu.pipeline_mode<synchronous>, transform_indices = @transform_1, window_bounds = array<i64: 4, 1>}, {transform_indices = @transform_2, window_bounds = array<i64: 128, 256>}, {transform_indices = @transform_3, window_bounds = array<i64: 4, 128>}, {transform_indices = @transform_4, window_bounds = array<i64: 1, 128>}]} {
    %c0 = arith.constant 0 : index
    %c0_0 = arith.constant 0 : index
    %0 = vector.load %arg1[%c0, %c0_0] : memref<4x256xf32, #tpu.memory_space<vmem>>, vector<4x256xf32>
    %c0_1 = arith.constant 0 : index
    %c0_2 = arith.constant 0 : index
    %1 = vector.load %arg3[%c0_1, %c0_2] : memref<128x256xf32, #tpu.memory_space<vmem>>, vector<128x256xf32>
    %cst = arith.constant dense<0.000000e+00> : vector<4x128xf32>
    %2 = tpu.matmul %0, %1, %cst {dimension_numbers = #tpu.dot_dimension_numbers<[1], [1], [0], [0], [0, 0, 1, 0], [], []>} : vector<4x256xf32>, vector<128x256xf32>, vector<4x128xf32> -> vector<4x128xf32>
    %c0_3 = arith.constant 0 : index
    %c0_4 = arith.constant 0 : index
    %3 = vector.load %arg2[%c0_3, %c0_4] : memref<4x1xf32, #tpu.memory_space<vmem>>, vector<4x1xf32>
    %4 = vector.broadcast %3 : vector<4x1xf32> to vector<4x128xf32>
    %5 = arith.addf %2, %4 : vector<4x128xf32>
    %6 = math.exp %5 : vector<4x128xf32>
    %c0_5 = arith.constant 0 : index
    %c0_6 = arith.constant 0 : index
    %7 = vector.load %arg4[%c0_5, %c0_6] : memref<4x128xf32, #tpu.memory_space<vmem>>, vector<4x128xf32>
    %8 = arith.mulf %5, %7 : vector<4x128xf32>
    %9 = arith.subf %6, %8 : vector<4x128xf32>
    %cst_7 = arith.constant dense<0.000000e+00> : vector<128xf32>
    %10 = vector.multi_reduction <add>, %9, %cst_7 [0] : vector<4x128xf32> to vector<128xf32>
    %11 = vector.shape_cast %10 : vector<128xf32> to vector<1x128xf32>
    %c0_8 = arith.constant 0 : index
    %c0_9 = arith.constant 0 : index
    %12 = vector.load %arg5[%c0_8, %c0_9] : memref<1x128xf32, #tpu.memory_space<vmem>>, vector<1x128xf32>
    tpu.vector_store %arg5[%c0_8, %c0_9], %11 {strides = array<i32>} : memref<1x128xf32, #tpu.memory_space<vmem>>, vector<1x128xf32>,
    return
  }
  func.func @transform_0(%arg0: i32) -> (i32, i32) {
    %c0_i32 = arith.constant 0 : i32
    %c0_i32_0 = arith.constant 0 : i32
    %c0_i32_1 = arith.constant 0 : i32
    return %c0_i32, %c0_i32_0 : i32, i32
  }
  func.func @transform_1(%arg0: i32) -> (i32, i32) {
    %c0_i32 = arith.constant 0 : i32
    %c0_i32_0 = arith.constant 0 : i32
    %c0_i32_1 = arith.constant 0 : i32
    return %c0_i32, %c0_i32_0 : i32, i32
  }
  func.func @transform_2(%arg0: i32) -> (i32, i32) {
    %c0_i32 = arith.constant 0 : i32
    %c0_i32_0 = arith.constant 0 : i32
    return %arg0, %c0_i32 : i32, i32
  }
  func.func @transform_3(%arg0: i32) -> (i32, i32) {
    %c0_i32 = arith.constant 0 : i32
    %c0_i32_0 = arith.constant 0 : i32
    return %c0_i32, %arg0 : i32, i32
  }
  func.func @transform_4(%arg0: i32) -> (i32, i32) {
    %c0_i32 = arith.constant 0 : i32
    %c0_i32_0 = arith.constant 0 : i32
    return %c0_i32, %arg0 : i32, i32
  }
}

</mosaic_0001>

<bundles_post_ra>
// kernel: tpu_custom_call.1
= control target key start
LH: loop header
LB: loop body
LE: loop exit
PB: predicated region body
PF: predicated region fallthrough
CT: control target
= control target key end

     0   :  { %9 = vsyncpa [#allocation3], 0  ;;  %s380_s0 = inlined_call_operand.hbm [shape: f32[4,256], index: 0, kind: input, shape index: {}]   ;;  %s381_s1 = inlined_call_operand.vmem [shape: f32[4,1], index: 1, kind: input, shape index: {}]   ;;  %s382_s2 = inlined_call_operand.hbm [shape: f32[128,256], index: 2, kind: input, shape index: {}]   ;;  %s383_s3 = inlined_call_operand.vmem [shape: f32[4,128], index: 3, kind: input, shape index: {}]   ;;  %s384_s4 = inlined_call_operand.hbm [shape: f32[1,128], index: 4, kind: output, shape index: {}]  }
   0x1   :  { %10 = vsyncpa [#allocation6], 0 }
   0x2   :  { %11 = vsyncpa [#allocation4], 0  ;;  %s300_s15 = smov [#allocation2]   ;;  %s301_s17 = smov [#allocation5]  }
   0x3   :  { %s18_s16 = sshll.u32 %s300_s15, 4  ;;  %s29_s18 = sshll.u32 %s301_s17, 4  ;;  %s19_s16 = int_to_ptr.vmem [resolvable:$true] %s18_s16  ;;  %s331_s18 = int_to_ptr.vmem [resolvable:$true] %s29_s18 }
   0x4   :  { %s228_s21 = scalar_lea.hbm %s380_s0, 128 }
   0x5   :  { %p229_p0 = scmp.ne.s32.totalorder %s380_s0, %s228_s21  ;;  %p232_p1 = scmp.lt.u32.totalorder %s228_s21, %s380_s0 }
   0x7   :  { %p234_p2 = pnand %p232_p1, %p229_p0 }
   0x9   :  { %237 = shalt.err (!%p234_p2)
}
   0xa   :  { %s238_s26 = scalar_lea.vmem %s19_s16, 128  ;;  %p243_p4 = scmp.lt.s32.totalorder %s19_s16, %s19_s16 }
   0xb   :  { %p239_p3 = scmp.ne.s32.totalorder %s19_s16, %s238_s26  ;;  %p244_p5 = scmp.lt.s32.totalorder %s238_s26, %s238_s26 }
   0xd   :  { %p245_p6 = por %p244_p5, %p243_p4 }
   0xf   :  { %p246_p7 = pnand %p245_p6, %p239_p3 }
  0x11   :  { %249 = shalt.err (!%p246_p7)
}
  0x12   :  { %21 = dma.hbm_to_vmem [thread:$0]  %s380_s0, 128, %s19_s16, [#allocation3]  }
  0x13   :  { %s250_s5 = scalar_lea.hbm %s382_s2, 4096 }
  0x14   :  { %p251_p8 = scmp.ne.s32.totalorder %s382_s2, %s250_s5  ;;  %p254_p9 = scmp.lt.u32.totalorder %s250_s5, %s382_s2 }
  0x16   :  { %p256_p10 = pnand %p254_p9, %p251_p8 }
  0x18   :  { %259 = shalt.err (!%p256_p10)
}
  0x19   :  { %s260_s10 = scalar_lea.vmem %s331_s18, 4096  ;;  %p265_p12 = scmp.lt.s32.totalorder %s331_s18, %s331_s18 }
  0x1a   :  { %p261_p11 = scmp.ne.s32.totalorder %s331_s18, %s260_s10  ;;  %p266_p13 = scmp.lt.s32.totalorder %s260_s10, %s260_s10 }
  0x1c   :  { %p267_p0 = por %p266_p13, %p265_p12 }
  0x1e   :  { %p268_p1 = pnand %p267_p0, %p261_p11 }
  0x20   :  { %271 = shalt.err (!%p268_p1)
}
  0x21   :  { %s302_s0 = smov 256   ;;  %s303_s11 = smov 16  }
  0x22   :  { %35 = dma.hbm_to_vmem [thread:$0]  %s382_s2, 4096, %s331_s18, [#allocation6], %s302_s0, %s302_s0, %s303_s11  }
  0x23   :  { %294 = dma.done.wait [#allocation3], 128  }
  0x24   :  { %295 = vsyncadd [#allocation3], 4294967168 }
  0x25   :  { %296 = dma.done.wait [#allocation6], 4096  }
  0x26   :  { %297 = vsyncadd [#allocation6], 4294963200  ;;  %v304_v0 = vmov 0   ;;  %v46_v1 = vld [vmem:[#allocation5 + $0x8] sm:$0xff]  ;;  %v48_v2 = vld [vmem:[#allocation5 + $0x18] sm:$0xff]  ;;  %vm161_vm0 = vcmask 1043456  }
  0x27   :  { %224 = vset.pattern.permute.xlu0 %v304_v0  ;;  %v45_v3 = vld [vmem:[#allocation5] sm:$0xff]  ;;  %v186_v4 = vpack.c.bf16 %v48_v2, %v46_v1  ;;  %v47_v5 = vld [vmem:[#allocation5 + $0x10] sm:$0xff]  ;;  %v50_v6 = vld [vmem:[#allocation5 + $0x28] sm:$0xff]  ;;  %s305_s16 = smov [#allocation7]  }
  0x28   :  { %v52_v7 = vld [vmem:[#allocation5 + $0x38] sm:$0xff]  ;;  %v188_v8 = vpack.c.bf16 %v47_v5, %v45_v3  ;;  %v49_v10 = vld [vmem:[#allocation5 + $0x20] sm:$0xff]  ;;  %v51_v11 = vld [vmem:[#allocation5 + $0x30] sm:$0xff]  ;;  %s176_s17 = sshll.u32 %s305_s16, 4  ;;  %s177_s17 = int_to_ptr.vmem [resolvable:$true] %s176_s17 }
  0x29   :  { %v190_v9 = vpack.c.bf16 %v52_v7, %v50_v6  ;;  %187 = vmatprep.subr.bf16.mxu0 %v186_v4  ;;  %v54_v12 = vld [vmem:[#allocation5 + $0x48] sm:$0xff]  ;;  %v56_v13 = vld [vmem:[#allocation5 + $0x58] sm:$0xff]  ;;  %v192_v14 = vpack.c.bf16 %v51_v11, %v49_v10  ;;  %v53_v19 = vld [vmem:[#allocation5 + $0x40] sm:$0xff]  ;;  %s272_s18 = scalar_lea.vmem %s177_s17, 16  ;;  %s276_s19 = scalar_lea.vmem %s177_s17, 32 }
  0x2a   :  { %189 = vmatpush1.bf16.xpose.msra.mxu0 %v188_v8  ;;  %v194_v15 = vpack.c.bf16 %v56_v13, %v54_v12  ;;  %v44_v16 = vld [vmem:[#allocation2] sm:$0xff]  ;;  %v55_v20 = vld [vmem:[#allocation5 + $0x50] sm:$0xff]  ;;  %v58_v21 = vld [vmem:[#allocation5 + $0x68] sm:$0xff]  ;;  %p273_p2 = scmp.ne.s32.totalorder %s177_s17, %s272_s18  ;;  %p277_p3 = scmp.lt.s32.totalorder %s177_s17, %s177_s17 }
  0x2b   :  { %191 = vmatprep.subr.bf16.mxu0 %v190_v9  ;;  %v84_v17 = vcombine.high %v44_v16, %v44_v16  ;;  %v77_v18 = vld [vmem:[%s381_s1] sm:$0xf]  ;;  %v196_v23 = vpack.c.bf16 %v55_v20, %v53_v19  ;;  %v57_v25 = vld [vmem:[#allocation5 + $0x60] sm:$0xff]  ;;  %v59_v26 = vld [vmem:[#allocation5 + $0x70] sm:$0xff]  ;;  %p278_p4 = scmp.lt.s32.totalorder %s276_s19, %s272_s18 }
  0x2c   :  { %80 = vperm.xlu0 %224, %v77_v18   ;;  %v60_v22 = vld [vmem:[#allocation5 + $0x78] sm:$0xff]  ;;  %v62_v27 = vld [vmem:[#allocation5 + $0x88] sm:$0xff]  ;;  %v200_v29 = vpack.c.bf16 %v59_v26, %v57_v25  ;;  %v61_v31 = vld [vmem:[#allocation5 + $0x80] sm:$0xff] }
  0x2d   :  { %150 = vmatprep.mubr.f32.mxu0 %v84_v17  ;;  %v198_v24 = vpack.c.bf16 %v60_v22, %v58_v21  ;;  %v64_v28 = vld [vmem:[#allocation5 + $0x98] sm:$0xff]  ;;  %v63_v32 = vld [vmem:[#allocation5 + $0x90] sm:$0xff]  ;;  %v66_v33 = vld [vmem:[#allocation5 + $0xa8] sm:$0xff]  ;;  %p279_p5 = por %p278_p4, %p277_p3 }
  0x2e   :  { %v202_v30 = vpack.c.bf16 %v64_v28, %v62_v27  ;;  %v68_v34 = vld [vmem:[#allocation5 + $0xb8] sm:$0xff]  ;;  %v204_v35 = vpack.c.bf16 %v63_v32, %v61_v31  ;;  %v65_v37 = vld [vmem:[#allocation5 + $0xa0] sm:$0xff]  ;;  %v67_v38 = vld [vmem:[#allocation5 + $0xb0] sm:$0xff] }
  0x2f   :  { %v206_v36 = vpack.c.bf16 %v68_v34, %v66_v33  ;;  %v70_v39 = vld [vmem:[#allocation5 + $0xc8] sm:$0xff]  ;;  %v72_v40 = vld [vmem:[#allocation5 + $0xd8] sm:$0xff]  ;;  %v208_v41 = vpack.c.bf16 %v67_v38, %v65_v37  ;;  %v69_v43 = vld [vmem:[#allocation5 + $0xc0] sm:$0xff]  ;;  %p280_p6 = pnand %p279_p5, %p273_p2 }
  0x30   :  { %v210_v42 = vpack.c.bf16 %v72_v40, %v70_v39  ;;  %v71_v44 = vld [vmem:[#allocation5 + $0xd0] sm:$0xff]  ;;  %v74_v45 = vld [vmem:[#allocation5 + $0xe8] sm:$0xff]  ;;  %v76_v46 = vld [vmem:[#allocation5 + $0xf8] sm:$0xff] }
  0x31   :  { %v212_v47 = vpack.c.bf16 %v71_v44, %v69_v43  ;;  %v214_v48 = vpack.c.bf16 %v76_v46, %v74_v45  ;;  %v73_v49 = vld [vmem:[#allocation5 + $0xe0] sm:$0xff]  ;;  %v75_v50 = vld [vmem:[#allocation5 + $0xf0] sm:$0xff]  ;;  %v158_v57 = vld [vmem:[%s383_s3] sm:$0xf] }
  0x32   :  { %193 = vmatpush1.bf16.xpose.msra.mxu0 %v192_v14  ;;  %v216_v51 = vpack.c.bf16 %v75_v50, %v73_v49 }
  0x33   :  { %195 = vmatprep.subr.bf16.mxu0 %v194_v15 }
  0x3a   :  { %197 = vmatpush1.bf16.xpose.msra.mxu0 %v196_v23 }
  0x3b   :  { %199 = vmatprep.subr.bf16.mxu0 %v198_v24 }
  0x42   :  { %201 = vmatpush1.bf16.xpose.msra.mxu0 %v200_v29 }
  0x43   :  { %203 = vmatprep.subr.bf16.mxu0 %v202_v30 }
  0x4a   :  { %205 = vmatpush1.bf16.xpose.msra.mxu0 %v204_v35 }
  0x4b   :  { %207 = vmatprep.subr.bf16.mxu0 %v206_v36 }
  0x52   :  { %209 = vmatpush1.bf16.xpose.msra.mxu0 %v208_v41 }
  0x53   :  { %211 = vmatprep.subr.bf16.mxu0 %v210_v42 }
  0x5a   :  { %213 = vmatpush1.bf16.xpose.msra.mxu0 %v212_v47 }
  0x5b   :  { %215 = vmatprep.subr.bf16.mxu0 %v214_v48 }
  0x62   :  { %217 = vmatpush1.bf16.xpose.msra.mxu0 %v216_v51 }
  0x69   :  { %151 = vmatmul.mubr.f32.vlgmr.msra.gmra.mrb[0].mxu0 %v44_v16 }
  0xab   :  { %v81_v52 = vpop.permute.xlu0 %80 }
 0x13c   :  { %v152_v53 = vpop.f32.mrb[0].mxu0 }
 0x13d   :  { %v153_v54 = vadd.f32 %v152_v53, %v81_v52  ;;  %v154_v55 = vpop.f32.mrb[1].mxu0 }
 0x13f   :  { %v156_v56 = vmul.f32 1.442695, %v153_v54  ;;  %v159_v58 = vmul.f32 %v158_v57, %v153_v54 }
 0x141   :  { %226 = vpow2.f32 %v156_v56 }
 0x14b   :  { %v227_v59 = vpop.eup %226 }
 0x14c   :  { %v160_v60 = vsub.f32 %v227_v59, %v159_v58 }
 0x14e   :  { %v162_v61 = vsel %vm161_vm0, %v160_v60, 0.0 }
 0x14f   :  { %v163_v62 = vrot.slane %v162_v61, 4 }
 0x151   :  { %v164_v63 = vadd.f32 %v163_v62, %v162_v61 }
 0x153   :  { %v165_v0 = vrot.slane %v164_v63, 2 }
 0x155   :  { %v166_v1 = vadd.f32 %v165_v0, %v164_v63 }
 0x157   :  { %v167_v2 = vrot.slane %v166_v1, 1 }
 0x159   :  { %v168_v3 = vadd.f32 %v167_v2, %v166_v1 }
 0x15b   :  { %169 = vst [vmem:[#allocation7] sm:$0x1] %v168_v3 }
 0x15c   :  { %283 = shalt.err (!%p280_p6)
}
 0x15d   :  { %s284_s21 = scalar_lea.hbm %s384_s4, 16 }
 0x15e   :  { %p285_p7 = scmp.ne.s32.totalorder %s384_s4, %s284_s21  ;;  %p288_p8 = scmp.lt.u32.totalorder %s284_s21, %s384_s4 }
 0x160   :  { %p290_p9 = pnand %p288_p8, %p285_p7 }
 0x162   :  { %293 = shalt.err (!%p290_p9)
}
 0x163   :  { %179 = dma.vmem_to_hbm [thread:$0]  %s177_s17, 16, %s384_s4, [#allocation4]  }
 0x164   :  { %298 = dma.done.wait [#allocation4], 16  }
 0x165   :  { %299 = vsyncadd [#allocation4], 4294967280 }
 0x166   :  { %183 = vsyncpa [#allocation3], 1 }
 0x167   :  { %184 = vsyncpa [#allocation6], 1 }
 0x168   :  { %185 = vsyncpa [#allocation4], 1 }

</bundles_post_ra>
